<compile_context>
chip_gen: v7x
topology: tpu7x:2x2x1
jax: 0.10.0
libtpu: 0.0.40
codegen_flags: <defaults>
</compile_context>

<pallas_src>
import jax
import jax.numpy as jnp
from jax.experimental import pallas as pl
from jax.experimental.pallas import tpu as pltpu


def _round_up(x, m):
    return ((x + m - 1) // m) * m


def dqn_kernel(x_ref, w1_ref, b1_ref, w2_ref, b2_ref, w3_ref, b3_ref, o_ref):
    # fc1 + ReLU   (MXU matmul with f32 accumulation, VPU bias-add + max)
    h1 = jnp.dot(x_ref[...], w1_ref[...], preferred_element_type=jnp.float32)
    h1 = jnp.maximum(h1 + b1_ref[...], 0.0)
    # fc2 + ReLU   (cast activations back to the weight dtype so bf16 weights keep
    #               bf16 MXU inputs; identity cast in the f32 path)
    h2 = jnp.dot(h1.astype(w2_ref.dtype), w2_ref[...],
                 preferred_element_type=jnp.float32)
    h2 = jnp.maximum(h2 + b2_ref[...], 0.0)
    # fc3 (no activation) -> lane-dense (128-padded) output slab
    o = jnp.dot(h2.astype(w3_ref.dtype), w3_ref[...],
                preferred_element_type=jnp.float32) + b3_ref[...]
    o_ref[...] = o.astype(o_ref.dtype)


def dqn_forward(x, params, num_drones, coarse_action_size, *,
                block_m=1024, use_bf16=True, out_dtype=jnp.float32,
                min_grid_steps=1, core_parallel=False, return_padded=False):
    """x: [B, state_size].

    Default: returns [B, num_drones, coarse_action_size] in `out_dtype`.
    return_padded=True: returns the raw lane-dense kernel output [b_pad, out_pad]
    (first B rows / first num_drones*coarse_action_size lanes are valid) so consumers
    can avoid a separate slice pass over HBM.
    """
    w1, b1, w2, b2, w3, b3 = params
    B, S = x.shape
    H1 = w1.shape[1]
    H2 = w2.shape[1]
    total_action = w3.shape[1]

    # --- lane-dense output: pad fc3 out dim up to a multiple of 128 lanes (zeros) ---
    out_pad = _round_up(total_action, 128)
    if out_pad != total_action:
        w3 = jnp.pad(w3, ((0, 0), (0, out_pad - total_action)))
        b3 = jnp.pad(b3, ((0, 0), (0, out_pad - total_action)))

    # --- bf16 MXU inputs (weights + activations); f32 accumulation and f32 biases ---
    if use_bf16:
        x = x.astype(jnp.bfloat16)
        w1 = w1.astype(jnp.bfloat16)
        w2 = w2.astype(jnp.bfloat16)
        w3 = w3.astype(jnp.bfloat16)
    row_align = 16 if x.dtype == jnp.bfloat16 else 8   # (16,128) bf16 / (8,128) f32 tiles

    # --- batch tiling: balance rows across grid steps (minimizes padding), honour
    #     min_grid_steps (set >=2 on v7x so both TensorCores get a tile) ---
    n_steps = pl.cdiv(B, block_m)
    if B >= min_grid_steps * row_align:
        n_steps = max(n_steps, min_grid_steps)
    tm = min(block_m, _round_up(pl.cdiv(B, n_steps), row_align))
    b_pad = _round_up(B, tm)
    if b_pad != B:
        x = jnp.pad(x, ((0, b_pad - B), (0, 0)))
    grid = (b_pad // tm,)

    def resident(shape):
        # Constant index_map -> block never changes -> stays VMEM-resident across the grid.
        return pl.BlockSpec(shape, lambda i: (0, 0))

    # Scheduler hint derived from the actual layer shapes.
    flops = 2 * b_pad * (S * H1 + H1 * H2 + H2 * out_pad)
    bytes_accessed = (
        x.size * x.dtype.itemsize
        + sum(a.size * a.dtype.itemsize for a in (w1, b1, w2, b2, w3, b3))
        + b_pad * out_pad * jnp.dtype(out_dtype).itemsize
    )

    batch_sem = pltpu.CORE_PARALLEL if core_parallel else "parallel"

    out = pl.pallas_call(
        dqn_kernel,
        out_shape=jax.ShapeDtypeStruct((b_pad, out_pad), out_dtype),
        grid=grid,
        in_specs=[
            pl.BlockSpec((tm, S), lambda i: (i, 0)),   # x: tiled over batch
            resident(w1.shape), resident(b1.shape),
            resident(w2.shape), resident(b2.shape),
            resident(w3.shape), resident(b3.shape),
        ],
        out_specs=pl.BlockSpec((tm, out_pad), lambda i: (i, 0)),
        compiler_params=pltpu.CompilerParams(
            dimension_semantics=(batch_sem,),
        ),
        cost_estimate=pl.CostEstimate(
            flops=flops, transcendentals=0, bytes_accessed=bytes_accessed),
    )(x, w1, b1, w2, b2, w3, b3)

    if return_padded:
        return out                       # [b_pad, out_pad] lane-dense slab

    # Slice away batch/lane padding, then x.view(-1, num_drones, coarse_action_size).
    # (Run the wrapper under jit so this fuses with the reshape / downstream consumer.)
    out = out[:B, :total_action]
    return out.reshape(-1, num_drones, coarse_action_size)


def init_params(key, state_size, total_action_size):
    """Deterministic synthetic init (shapes match the DQN's nn.Linear layers)."""
    k1, k2, k3, k4, k5, k6 = jax.random.split(key, 6)
    w1 = jax.random.normal(k1, (state_size, 512), jnp.float32) * 0.05
    b1 = jax.random.normal(k2, (1, 512), jnp.float32) * 0.05
    w2 = jax.random.normal(k3, (512, 256), jnp.float32) * 0.05
    b2 = jax.random.normal(k4, (1, 256), jnp.float32) * 0.05
    w3 = jax.random.normal(k5, (256, total_action_size), jnp.float32) * 0.05
    b3 = jax.random.normal(k6, (1, total_action_size), jnp.float32) * 0.05
    return (w1, b1, w2, b2, w3, b3)


def reference_forward(x, params, num_drones, coarse_action_size):
    w1, b1, w2, b2, w3, b3 = params
    h1 = jnp.maximum(x @ w1 + b1, 0.0)
    h2 = jnp.maximum(h1 @ w2 + b2, 0.0)
    o = h2 @ w3 + b3
    return o.reshape(-1, num_drones, coarse_action_size)


if __name__ == "__main__":
    # Small, module-consistent shapes.
    state_size = 32
    num_drones = 4
    coarse_action_size = 8
    total_action_size = num_drones * coarse_action_size

    key = jax.random.PRNGKey(0)
    kx, kp, kx2 = jax.random.split(key, 3)
    params = init_params(kp, state_size, total_action_size)

    # Jitted wrappers so the post-kernel slice/reshape fuses with the call.
    fwd_bf16 = jax.jit(
        lambda x: dqn_forward(x, params, num_drones, coarse_action_size))
    fwd_f32 = jax.jit(
        lambda x: dqn_forward(x, params, num_drones, coarse_action_size,
                              use_bf16=False))

    # --- batch=2 (original tiny case; exercises row padding to 8/16 sublanes) ---
    x = jax.random.normal(kx, (2, state_size), jnp.float32)
    ref = reference_forward(x, params, num_drones, coarse_action_size)

    out_f32 = jax.block_until_ready(fwd_f32(x))
    assert out_f32.shape == (2, num_drones, coarse_action_size)
    assert jnp.allclose(out_f32, ref, atol=1e-4, rtol=1e-4)          # tight f32 check

    out_bf16 = jax.block_until_ready(fwd_bf16(x))
    assert out_bf16.shape == (2, num_drones, coarse_action_size)
    assert jnp.allclose(out_bf16, ref, atol=3e-2, rtol=3e-2)         # looser bf16 check

    # --- batch=20 (non-trivial row padding + lane-dense output slicing) ---
    x2 = jax.random.normal(kx2, (20, state_size), jnp.float32)
    ref2 = reference_forward(x2, params, num_drones, coarse_action_size)

    out2_f32 = jax.block_until_ready(fwd_f32(x2))
    assert out2_f32.shape == (20, num_drones, coarse_action_size)
    assert jnp.allclose(out2_f32, ref2, atol=1e-4, rtol=1e-4)

    out2_bf16 = jax.block_until_ready(fwd_bf16(x2))
    assert out2_bf16.shape == (20, num_drones, coarse_action_size)
    assert jnp.allclose(out2_bf16, ref2, atol=3e-2, rtol=3e-2)

    print("KERNEL_OK")
</pallas_src>

<mosaic_0001>
module attributes {stable_mosaic.version = 11 : i64} {
  func.func @dqn_kernel(%arg0: i32, %arg1: memref<8x32xf32, #tpu.memory_space<vmem>>, %arg2: memref<32x512xf32, #tpu.memory_space<vmem>>, %arg3: memref<1x512xf32, #tpu.memory_space<vmem>>, %arg4: memref<512x256xf32, #tpu.memory_space<vmem>>, %arg5: memref<1x256xf32, #tpu.memory_space<vmem>>, %arg6: memref<256x128xf32, #tpu.memory_space<vmem>>, %arg7: memref<1x128xf32, #tpu.memory_space<vmem>>, %arg8: memref<8x128xf32, #tpu.memory_space<vmem>>) attributes {dimension_semantics = [#tpu.dimension_semantics<parallel>], iteration_bounds = array<i64: 1>, scalar_prefetch = 0 : i64, scratch_operands = 0 : i64, tpu.core_type = #tpu.core_type<tc>, window_params = [{transform_indices = @transform_0, window_bounds = array<i64: 8, 32>}, {pipeline_mode = #tpu.pipeline_mode<synchronous>, transform_indices = @transform_1, window_bounds = array<i64: 32, 512>}, {pipeline_mode = #tpu.pipeline_mode<synchronous>, transform_indices = @transform_2, window_bounds = array<i64: 1, 512>}, {pipeline_mode = #tpu.pipeline_mode<synchronous>, transform_indices = @transform_3, window_bounds = array<i64: 512, 256>}, {pipeline_mode = #tpu.pipeline_mode<synchronous>, transform_indices = @transform_4, window_bounds = array<i64: 1, 256>}, {pipeline_mode = #tpu.pipeline_mode<synchronous>, transform_indices = @transform_5, window_bounds = array<i64: 256, 128>}, {pipeline_mode = #tpu.pipeline_mode<synchronous>, transform_indices = @transform_6, window_bounds = array<i64: 1, 128>}, {transform_indices = @transform_7, window_bounds = array<i64: 8, 128>}]} {
    %c0 = arith.constant 0 : index
    %c0_0 = arith.constant 0 : index
    %0 = vector.load %arg1[%c0, %c0_0] : memref<8x32xf32, #tpu.memory_space<vmem>>, vector<8x32xf32>
    %c0_1 = arith.constant 0 : index
    %c0_2 = arith.constant 0 : index
    %1 = vector.load %arg2[%c0_1, %c0_2] : memref<32x512xf32, #tpu.memory_space<vmem>>, vector<32x512xf32>
    %cst = arith.constant dense<0.000000e+00> : vector<8x512xf32>
    %2 = tpu.matmul %0, %1, %cst {dimension_numbers = #tpu.dot_dimension_numbers<[1], [0], [0], [1], [0, 0, 1, 1], [], []>} : vector<8x32xf32>, vector<32x512xf32>, vector<8x512xf32> -> vector<8x512xf32>
    %c0_3 = arith.constant 0 : index
    %c0_4 = arith.constant 0 : index
    %3 = vector.load %arg3[%c0_3, %c0_4] : memref<1x512xf32, #tpu.memory_space<vmem>>, vector<1x512xf32>
    %4 = vector.broadcast %3 : vector<1x512xf32> to vector<8x512xf32>
    %5 = arith.addf %2, %4 : vector<8x512xf32>
    %cst_5 = arith.constant 0.000000e+00 : f32
    %6 = vector.broadcast %cst_5 : f32 to vector<8x512xf32>
    %7 = arith.maximumf %5, %6 : vector<8x512xf32>
    %c0_6 = arith.constant 0 : index
    %c0_7 = arith.constant 0 : index
    %8 = vector.load %arg4[%c0_6, %c0_7] : memref<512x256xf32, #tpu.memory_space<vmem>>, vector<512x256xf32>
    %cst_8 = arith.constant dense<0.000000e+00> : vector<8x256xf32>
    %9 = tpu.matmul %7, %8, %cst_8 {dimension_numbers = #tpu.dot_dimension_numbers<[1], [0], [0], [1], [0, 0, 1, 1], [], []>} : vector<8x512xf32>, vector<512x256xf32>, vector<8x256xf32> -> vector<8x256xf32>
    %c0_9 = arith.constant 0 : index
    %c0_10 = arith.constant 0 : index
    %10 = vector.load %arg5[%c0_9, %c0_10] : memref<1x256xf32, #tpu.memory_space<vmem>>, vector<1x256xf32>
    %11 = vector.broadcast %10 : vector<1x256xf32> to vector<8x256xf32>
    %12 = arith.addf %9, %11 : vector<8x256xf32>
    %cst_11 = arith.constant 0.000000e+00 : f32
    %13 = vector.broadcast %cst_11 : f32 to vector<8x256xf32>
    %14 = arith.maximumf %12, %13 : vector<8x256xf32>
    %c0_12 = arith.constant 0 : index
    %c0_13 = arith.constant 0 : index
    %15 = vector.load %arg6[%c0_12, %c0_13] : memref<256x128xf32, #tpu.memory_space<vmem>>, vector<256x128xf32>
    %cst_14 = arith.constant dense<0.000000e+00> : vector<8x128xf32>
    %16 = tpu.matmul %14, %15, %cst_14 {dimension_numbers = #tpu.dot_dimension_numbers<[1], [0], [0], [1], [0, 0, 1, 1], [], []>} : vector<8x256xf32>, vector<256x128xf32>, vector<8x128xf32> -> vector<8x128xf32>
    %c0_15 = arith.constant 0 : index
    %c0_16 = arith.constant 0 : index
    %17 = vector.load %arg7[%c0_15, %c0_16] : memref<1x128xf32, #tpu.memory_space<vmem>>, vector<1x128xf32>
    %18 = vector.broadcast %17 : vector<1x128xf32> to vector<8x128xf32>
    %19 = arith.addf %16, %18 : vector<8x128xf32>
    %c0_17 = arith.constant 0 : index
    %c0_18 = arith.constant 0 : index
    %20 = vector.load %arg8[%c0_17, %c0_18] : memref<8x128xf32, #tpu.memory_space<vmem>>, vector<8x128xf32>
    tpu.vector_store %arg8[%c0_17, %c0_18], %19 {strides = array<i32>} : memref<8x128xf32, #tpu.memory_space<vmem>>, vector<8x128xf32>,
    return
  }
  func.func @transform_0(%arg0: i32) -> (i32, i32) {
    %c0_i32 = arith.constant 0 : i32
    %c0_i32_0 = arith.constant 0 : i32
    return %arg0, %c0_i32 : i32, i32
  }
  func.func @transform_1(%arg0: i32) -> (i32, i32) {
    %c0_i32 = arith.constant 0 : i32
    %c0_i32_0 = arith.constant 0 : i32
    %c0_i32_1 = arith.constant 0 : i32
    return %c0_i32, %c0_i32_0 : i32, i32
  }
  func.func @transform_2(%arg0: i32) -> (i32, i32) {
    %c0_i32 = arith.constant 0 : i32
    %c0_i32_0 = arith.constant 0 : i32
    %c0_i32_1 = arith.constant 0 : i32
    return %c0_i32, %c0_i32_0 : i32, i32
  }
  func.func @transform_3(%arg0: i32) -> (i32, i32) {
    %c0_i32 = arith.constant 0 : i32
    %c0_i32_0 = arith.constant 0 : i32
    %c0_i32_1 = arith.constant 0 : i32
    return %c0_i32, %c0_i32_0 : i32, i32
  }
  func.func @transform_4(%arg0: i32) -> (i32, i32) {
    %c0_i32 = arith.constant 0 : i32
    %c0_i32_0 = arith.constant 0 : i32
    %c0_i32_1 = arith.constant 0 : i32
    return %c0_i32, %c0_i32_0 : i32, i32
  }
  func.func @transform_5(%arg0: i32) -> (i32, i32) {
    %c0_i32 = arith.constant 0 : i32
    %c0_i32_0 = arith.constant 0 : i32
    %c0_i32_1 = arith.constant 0 : i32
    return %c0_i32, %c0_i32_0 : i32, i32
  }
  func.func @transform_6(%arg0: i32) -> (i32, i32) {
    %c0_i32 = arith.constant 0 : i32
    %c0_i32_0 = arith.constant 0 : i32
    %c0_i32_1 = arith.constant 0 : i32
    return %c0_i32, %c0_i32_0 : i32, i32
  }
  func.func @transform_7(%arg0: i32) -> (i32, i32) {
    %c0_i32 = arith.constant 0 : i32
    %c0_i32_0 = arith.constant 0 : i32
    return %arg0, %c0_i32 : i32, i32
  }
}

</mosaic_0001>

<bundles_post_ra>
// kernel: _lambda_.1
= control target key start
LH: loop header
LB: loop body
LE: loop exit
PB: predicated region body
PF: predicated region fallthrough
CT: control target
= control target key end

     0   :  { %12 = vsyncpa [#allocation3], 0  ;;  %s1071_s0 = inlined_call_operand.vmem [shape: f32[8,32], index: 0, kind: input, shape index: {}]   ;;  %s1072_s1 = inlined_call_operand.hbm [shape: f32[32,512], index: 1, kind: input, shape index: {}]   ;;  %s1073_s2 = inlined_call_operand.vmem [shape: f32[1,512], index: 2, kind: input, shape index: {}]   ;;  %s1074_s3 = inlined_call_operand.hbm [shape: f32[512,256], index: 3, kind: input, shape index: {}]   ;;  %s1075_s4 = inlined_call_operand.vmem [shape: f32[1,256], index: 4, kind: input, shape index: {}]   ;;  %s1076_s5 = inlined_call_operand.hbm [shape: f32[256,128], index: 5, kind: input, shape index: {}]   ;;  %s1077_s6 = inlined_call_operand.vmem [shape: f32[1,128], index: 6, kind: input, shape index: {}]   ;;  %s1078_s7 = inlined_call_operand.vmem [shape: f32[8,128], index: 7, kind: output, shape index: {}]  }
   0x1   :  { %13 = vsyncpa [#allocation5], 0  ;;  %s954_s24 = smov [#allocation4]   ;;  %s884_s28 = scalar_lea.hbm %s1074_s3, 16384 }
   0x2   :  { %s35_s25 = sshll.u32 %s954_s24, 4  ;;  %p885_p0 = scmp.ne.s32.totalorder %s1074_s3, %s884_s28  ;;  %s36_s25 = int_to_ptr.vmem [resolvable:$true] %s35_s25 }
   0x3   :  { %p888_p1 = scmp.lt.u32.totalorder %s884_s28, %s1074_s3 }
   0x5   :  { %p890_p2 = pnand %p888_p1, %p885_p0 }
   0x7   :  { %893 = shalt.err (!%p890_p2)
}
   0x8   :  { %s894_s10 = scalar_lea.vmem %s36_s25, 16384  ;;  %p899_p4 = scmp.lt.s32.totalorder %s36_s25, %s36_s25 }
   0x9   :  { %p895_p3 = scmp.ne.s32.totalorder %s36_s25, %s894_s10  ;;  %p900_p5 = scmp.lt.s32.totalorder %s894_s10, %s894_s10 }
   0xb   :  { %p901_p6 = por %p900_p5, %p899_p4 }
   0xd   :  { %p902_p7 = pnand %p901_p6, %p895_p3 }
   0xf   :  { %905 = shalt.err (!%p902_p7)
}
  0x10   :  { %s955_s11 = smov 256   ;;  %s956_s12 = smov 16  }
  0x11   :  { %41 = dma.hbm_to_vmem [thread:$0]  %s1074_s3, 16384, %s36_s25, [#allocation5], %s955_s11, %s955_s11, %s956_s12  }
  0x12   :  { %s957_s15 = smov [#allocation2]   ;;  %s906_s19 = scalar_lea.hbm %s1072_s1, 2048 }
  0x13   :  { %s21_s16 = sshll.u32 %s957_s15, 4  ;;  %p907_p8 = scmp.ne.s32.totalorder %s1072_s1, %s906_s19  ;;  %s22_s16 = int_to_ptr.vmem [resolvable:$true] %s21_s16 }
  0x14   :  { %p910_p9 = scmp.lt.u32.totalorder %s906_s19, %s1072_s1 }
  0x16   :  { %p912_p10 = pnand %p910_p9, %p907_p8 }
  0x18   :  { %915 = shalt.err (!%p912_p10)
}
  0x19   :  { %s916_s24 = scalar_lea.vmem %s22_s16, 2048  ;;  %p921_p12 = scmp.lt.s32.totalorder %s22_s16, %s22_s16 }
  0x1a   :  { %p917_p11 = scmp.ne.s32.totalorder %s22_s16, %s916_s24  ;;  %p922_p13 = scmp.lt.s32.totalorder %s916_s24, %s916_s24 }
  0x1c   :  { %p923_p0 = por %p922_p13, %p921_p12 }
  0x1e   :  { %p924_p1 = pnand %p923_p0, %p917_p11 }
  0x20   :  { %927 = shalt.err (!%p924_p1)
}
  0x21   :  { %s958_s3 = smov 512   ;;  %s959_s25 = smov 32  }
  0x22   :  { %27 = dma.hbm_to_vmem [thread:$0]  %s1072_s1, 2048, %s22_s16, [#allocation3], %s958_s3, %s958_s3, %s959_s25  }
  0x23   :  { %s960_s28 = smov [#allocation6]   ;;  %s928_s9 = scalar_lea.hbm %s1076_s5, 4096 }
  0x24   :  { %s49_s29 = sshll.u32 %s960_s28, 4  ;;  %p929_p2 = scmp.ne.s32.totalorder %s1076_s5, %s928_s9  ;;  %s50_s29 = int_to_ptr.vmem [resolvable:$true] %s49_s29 }
  0x25   :  { %p932_p3 = scmp.lt.u32.totalorder %s928_s9, %s1076_s5 }
  0x27   :  { %p934_p4 = pnand %p932_p3, %p929_p2 }
  0x29   :  { %937 = shalt.err (!%p934_p4)
}
  0x2a   :  { %s938_s14 = scalar_lea.vmem %s50_s29, 4096  ;;  %p943_p6 = scmp.lt.s32.totalorder %s50_s29, %s50_s29 }
  0x2b   :  { %p939_p5 = scmp.ne.s32.totalorder %s50_s29, %s938_s14  ;;  %p944_p7 = scmp.lt.s32.totalorder %s938_s14, %s938_s14 }
  0x2d   :  { %p945_p8 = por %p944_p7, %p943_p6 }
  0x2f   :  { %p946_p9 = pnand %p945_p8, %p939_p5 }
  0x31   :  { %949 = shalt.err (!%p946_p9)
}
  0x32   :  { %s961_s1 = smov 128   ;;  %s962_s15 = smov 8  }
  0x33   :  { %55 = dma.hbm_to_vmem [thread:$0]  %s1076_s5, 4096, %s50_s29, [#allocation5], %s961_s1, %s961_s1, %s962_s15  }
  0x34   :  { %950 = dma.done.wait [#allocation3], 2048  }
  0x35   :  { %951 = vsyncadd [#allocation3], 4294965248 }
  0x36   :  { %952 = dma.done.wait [#allocation5], 20480  }
  0x37   :  { %953 = vsyncadd [#allocation5], 4294946816  ;;  %v963_v0 = vmov 0.0   ;;  %v69_v1 = vld [vmem:[#allocation2 + $0x8] sm:$0xff]  ;;  %v68_v3 = vld [vmem:[#allocation2] sm:$0xff]  ;;  %vm106_vm0 = vcmask 261120  }
  0x38   :  { %174 = vmatprep.mubr.f32.mxu0 %v963_v0  ;;  %v73_v2 = vld [vmem:[#allocation2 + $0x28] sm:$0xff]  ;;  %v72_v5 = vld [vmem:[#allocation2 + $0x20] sm:$0xff]  ;;  %v71_v12 = vld [vmem:[#allocation2 + $0x18] sm:$0xff] }
  0x39   :  { %v694_v4 = vpack.c.bf16 %v73_v2, %v69_v1  ;;  %v77_v6 = vld [vmem:[#allocation2 + $0x48] sm:$0xff]  ;;  %v696_v8 = vpack.c.bf16 %v72_v5, %v68_v3  ;;  %v76_v10 = vld [vmem:[#allocation2 + $0x40] sm:$0xff]  ;;  %v75_v13 = vld [vmem:[#allocation2 + $0x38] sm:$0xff] }
  0x3a   :  { %v81_v7 = vld [vmem:[#allocation2 + $0x68] sm:$0xff]  ;;  %v80_v11 = vld [vmem:[#allocation2 + $0x60] sm:$0xff]  ;;  %v70_v15 = vld [vmem:[#allocation2 + $0x10] sm:$0xff]  ;;  %v702_v17 = vpack.c.bf16 %v75_v13, %v71_v12 }
  0x3b   :  { %v698_v9 = vpack.c.bf16 %v81_v7, %v77_v6  ;;  %695 = vmatprep.subr.bf16.mxu0 %v694_v4  ;;  %v700_v14 = vpack.c.bf16 %v80_v11, %v76_v10  ;;  %v74_v16 = vld [vmem:[#allocation2 + $0x30] sm:$0xff]  ;;  %v79_v18 = vld [vmem:[#allocation2 + $0x58] sm:$0xff]  ;;  %v257_v20 = vld [vmem:[#allocation4 + $0x8] sm:$0xff] }
  0x3c   :  { %697 = vmatpush1.bf16.msra.mxu0 %v696_v8  ;;  %v83_v19 = vld [vmem:[#allocation2 + $0x78] sm:$0xff]  ;;  %v67_v21 = vld [vmem:[%s1071_s0] sm:$0xff]  ;;  %v258_v24 = vld [vmem:[#allocation4 + $0x10] sm:$0xff]  ;;  %v704_v30 = vpack.c.bf16 %v74_v16, %v70_v15 }
  0x3d   :  { %699 = vmatprep.subr.bf16.mxu0 %v698_v9  ;;  %v259_v22 = vld [vmem:[#allocation4 + $0x18] sm:$0xff]  ;;  %v256_v23 = vld [vmem:[#allocation4] sm:$0xff]  ;;  %v261_v27 = vld [vmem:[#allocation4 + $0x28] sm:$0xff]  ;;  %v706_v35 = vpack.c.bf16 %v83_v19, %v79_v18 }
  0x3e   :  { %v710_v25 = vpack.c.bf16 %v259_v22, %v257_v20  ;;  %v712_v26 = vpack.c.bf16 %v258_v24, %v256_v23  ;;  %v263_v28 = vld [vmem:[#allocation4 + $0x38] sm:$0xff]  ;;  %v260_v29 = vld [vmem:[#allocation4 + $0x20] sm:$0xff]  ;;  %v262_v32 = vld [vmem:[#allocation4 + $0x30] sm:$0xff] }
  0x3f   :  { %v714_v31 = vpack.c.bf16 %v263_v28, %v261_v27  ;;  %v265_v33 = vld [vmem:[#allocation4 + $0x48] sm:$0xff]  ;;  %v267_v34 = vld [vmem:[#allocation4 + $0x58] sm:$0xff]  ;;  %v78_v36 = vld [vmem:[#allocation2 + $0x50] sm:$0xff]  ;;  %v716_v38 = vpack.c.bf16 %v262_v32, %v260_v29 }
  0x40   :  { %701 = vmatpush1.bf16.msra.mxu0 %v700_v14  ;;  %v82_v37 = vld [vmem:[#allocation2 + $0x70] sm:$0xff]  ;;  %711 = vmatprep.subr.bf16.mxu1 %v710_v25  ;;  %v321_v39 = vld [vmem:[#allocation4 + $0x208] sm:$0xff]  ;;  %v323_v40 = vld [vmem:[#allocation4 + $0x218] sm:$0xff]  ;;  %v718_v41 = vpack.c.bf16 %v267_v34, %v265_v33 }
  0x41   :  { %703 = vmatprep.subr.bf16.mxu0 %v702_v17  ;;  %713 = vmatpush1.bf16.msra.mxu1 %v712_v26  ;;  %v264_v42 = vld [vmem:[#allocation4 + $0x40] sm:$0xff]  ;;  %v266_v43 = vld [vmem:[#allocation4 + $0x50] sm:$0xff]  ;;  %v708_v44 = vpack.c.bf16 %v82_v37, %v78_v36  ;;  %v269_v45 = vld [vmem:[#allocation4 + $0x68] sm:$0xff]  ;;  %v774_v47 = vpack.c.bf16 %v323_v40, %v321_v39 }
  0x42   :  { %715 = vmatprep.subr.bf16.mxu1 %v714_v31  ;;  %v271_v46 = vld [vmem:[#allocation4 + $0x78] sm:$0xff]  ;;  %v320_v48 = vld [vmem:[#allocation4 + $0x200] sm:$0xff]  ;;  %v322_v49 = vld [vmem:[#allocation4 + $0x210] sm:$0xff]  ;;  %v720_v50 = vpack.c.bf16 %v266_v43, %v264_v42 }
  0x43   :  { %656 = vmatmul.mubr.msk.f32.vlgmr.msra.gmra.mrb[0].mxu0 %vm106_vm0, %v67_v21  ;;  %v325_v51 = vld [vmem:[#allocation4 + $0x228] sm:$0xff]  ;;  %v327_v52 = vld [vmem:[#allocation4 + $0x238] sm:$0xff]  ;;  %v722_v53 = vpack.c.bf16 %v271_v46, %v269_v45  ;;  %v268_v54 = vld [vmem:[#allocation4 + $0x60] sm:$0xff]  ;;  %v776_v56 = vpack.c.bf16 %v322_v49, %v320_v48 }
  0x44   :  { %705 = vmatpush1.bf16.msra.mxu0 %v704_v30  ;;  %245 = vmatprep.mubr.f32.mxu0 %v963_v0  ;;  %v270_v55 = vld [vmem:[#allocation4 + $0x70] sm:$0xff]  ;;  %v273_v57 = vld [vmem:[#allocation4 + $0x88] sm:$0xff]  ;;  %v275_v58 = vld [vmem:[#allocation4 + $0x98] sm:$0xff]  ;;  %v778_v59 = vpack.c.bf16 %v327_v52, %v325_v51 }
  0x45   :  { %707 = vmatprep.subr.bf16.mxu0 %v706_v35  ;;  %717 = vmatpush1.bf16.msra.mxu1 %v716_v38  ;;  %v324_v60 = vld [vmem:[#allocation4 + $0x220] sm:$0xff]  ;;  %v326_v61 = vld [vmem:[#allocation4 + $0x230] sm:$0xff]  ;;  %v724_v62 = vpack.c.bf16 %v270_v55, %v268_v54  ;;  %v329_v63 = vld [vmem:[#allocation4 + $0x248] sm:$0xff]  ;;  %v726_v1 = vpack.c.bf16 %v275_v58, %v273_v57 }
  0x46   :  { %719 = vmatprep.subr.bf16.mxu1 %v718_v41  ;;  %v331_v0 = vld [vmem:[#allocation4 + $0x258] sm:$0xff]  ;;  %v272_v2 = vld [vmem:[#allocation4 + $0x80] sm:$0xff]  ;;  %v274_v3 = vld [vmem:[#allocation4 + $0x90] sm:$0xff]  ;;  %v780_v4 = vpack.c.bf16 %v326_v61, %v324_v60 }
  0x47   :  { %v277_v5 = vld [vmem:[#allocation4 + $0xa8] sm:$0xff]  ;;  %v279_v6 = vld [vmem:[#allocation4 + $0xb8] sm:$0xff]  ;;  %v782_v7 = vpack.c.bf16 %v331_v0, %v329_v63  ;;  %v328_v8 = vld [vmem:[#allocation4 + $0x240] sm:$0xff]  ;;  %v728_v10 = vpack.c.bf16 %v274_v3, %v272_v2 }
  0x48   :  { %709 = vmatpush1.bf16.msra.mxu0 %v708_v44  ;;  %v330_v9 = vld [vmem:[#allocation4 + $0x250] sm:$0xff]  ;;  %v333_v11 = vld [vmem:[#allocation4 + $0x268] sm:$0xff]  ;;  %v335_v12 = vld [vmem:[#allocation4 + $0x278] sm:$0xff]  ;;  %v730_v13 = vpack.c.bf16 %v279_v6, %v277_v5 }
  0x49   :  { %775 = vmatprep.subr.bf16.mxu0 %v774_v47  ;;  %721 = vmatpush1.bf16.msra.mxu1 %v720_v50  ;;  %v276_v14 = vld [vmem:[#allocation4 + $0xa0] sm:$0xff]  ;;  %v278_v15 = vld [vmem:[#allocation4 + $0xb0] sm:$0xff]  ;;  %v784_v16 = vpack.c.bf16 %v330_v9, %v328_v8  ;;  %v281_v17 = vld [vmem:[#allocation4 + $0xc8] sm:$0xff]  ;;  %v786_v19 = vpack.c.bf16 %v335_v12, %v333_v11 }
  0x4a   :  { %723 = vmatprep.subr.bf16.mxu1 %v722_v53  ;;  %v283_v18 = vld [vmem:[#allocation4 + $0xd8] sm:$0xff]  ;;  %v332_v20 = vld [vmem:[#allocation4 + $0x260] sm:$0xff]  ;;  %v732_v22 = vpack.c.bf16 %v278_v15, %v276_v14  ;;  %v337_v23 = vld [vmem:[#allocation4 + $0x288] sm:$0xff] }
  0x4b   :  { %657 = vmatmul.mubr.msk.f32.vlgmr.msra.gmra.mrb[2].mxu0 %vm106_vm0, %v67_v21  ;;  %v334_v21 = vld [vmem:[#allocation4 + $0x270] sm:$0xff]  ;;  %v339_v24 = vld [vmem:[#allocation4 + $0x298] sm:$0xff]  ;;  %v734_v25 = vpack.c.bf16 %v283_v18, %v281_v17  ;;  %v280_v26 = vld [vmem:[#allocation4 + $0xc0] sm:$0xff] }
  0x4c   :  { %777 = vmatpush1.bf16.msra.mxu0 %v776_v56  ;;  %v282_v27 = vld [vmem:[#allocation4 + $0xd0] sm:$0xff]  ;;  %v788_v28 = vpack.c.bf16 %v334_v21, %v332_v20  ;;  %v285_v29 = vld [vmem:[#allocation4 + $0xe8] sm:$0xff]  ;;  %v287_v30 = vld [vmem:[#allocation4 + $0xf8] sm:$0xff]  ;;  %v790_v31 = vpack.c.bf16 %v339_v24, %v337_v23 }
  0x4d   :  { %779 = vmatprep.subr.bf16.mxu0 %v778_v59  ;;  %725 = vmatpush1.bf16.msra.mxu1 %v724_v62  ;;  %v336_v32 = vld [vmem:[#allocation4 + $0x280] sm:$0xff]  ;;  %v338_v33 = vld [vmem:[#allocation4 + $0x290] sm:$0xff]  ;;  %v736_v34 = vpack.c.bf16 %v282_v27, %v280_v26  ;;  %v341_v35 = vld [vmem:[#allocation4 + $0x2a8] sm:$0xff]  ;;  %v738_v37 = vpack.c.bf16 %v287_v30, %v285_v29 }
  0x4e   :  { %727 = vmatprep.subr.bf16.mxu1 %v726_v1  ;;  %v343_v36 = vld [vmem:[#allocation4 + $0x2b8] sm:$0xff]  ;;  %v284_v38 = vld [vmem:[#allocation4 + $0xe0] sm:$0xff]  ;;  %v286_v39 = vld [vmem:[#allocation4 + $0xf0] sm:$0xff]  ;;  %v792_v40 = vpack.c.bf16 %v338_v33, %v336_v32 }
  0x4f   :  { %v289_v41 = vld [vmem:[#allocation4 + $0x108] sm:$0xff]  ;;  %v291_v42 = vld [vmem:[#allocation4 + $0x118] sm:$0xff]  ;;  %v794_v43 = vpack.c.bf16 %v343_v36, %v341_v35  ;;  %v340_v44 = vld [vmem:[#allocation4 + $0x2a0] sm:$0xff]  ;;  %v740_v46 = vpack.c.bf16 %v286_v39, %v284_v38 }
  0x50   :  { %781 = vmatpush1.bf16.msra.mxu0 %v780_v4  ;;  %v342_v45 = vld [vmem:[#allocation4 + $0x2b0] sm:$0xff]  ;;  %v345_v47 = vld [vmem:[#allocation4 + $0x2c8] sm:$0xff]  ;;  %v347_v48 = vld [vmem:[#allocation4 + $0x2d8] sm:$0xff]  ;;  %v742_v49 = vpack.c.bf16 %v291_v42, %v289_v41 }
  0x51   :  { %783 = vmatprep.subr.bf16.mxu0 %v782_v7  ;;  %729 = vmatpush1.bf16.msra.mxu1 %v728_v10  ;;  %v288_v50 = vld [vmem:[#allocation4 + $0x100] sm:$0xff]  ;;  %v290_v51 = vld [vmem:[#allocation4 + $0x110] sm:$0xff]  ;;  %v796_v52 = vpack.c.bf16 %v342_v45, %v340_v44  ;;  %v293_v53 = vld [vmem:[#allocation4 + $0x128] sm:$0xff]  ;;  %v798_v55 = vpack.c.bf16 %v347_v48, %v345_v47 }
  0x52   :  { %731 = vmatprep.subr.bf16.mxu1 %v730_v13  ;;  %v295_v54 = vld [vmem:[#allocation4 + $0x138] sm:$0xff]  ;;  %v344_v56 = vld [vmem:[#allocation4 + $0x2c0] sm:$0xff]  ;;  %v346_v57 = vld [vmem:[#allocation4 + $0x2d0] sm:$0xff]  ;;  %v744_v58 = vpack.c.bf16 %v290_v51, %v288_v50 }
  0x53   :  { %v349_v59 = vld [vmem:[#allocation4 + $0x2e8] sm:$0xff]  ;;  %v351_v60 = vld [vmem:[#allocation4 + $0x2f8] sm:$0xff]  ;;  %v746_v61 = vpack.c.bf16 %v295_v54, %v293_v53  ;;  %v292_v62 = vld [vmem:[#allocation4 + $0x120] sm:$0xff]  ;;  %v800_v0 = vpack.c.bf16 %v346_v57, %v344_v56 }
  0x54   :  { %785 = vmatpush1.bf16.msra.mxu0 %v784_v16  ;;  %v294_v63 = vld [vmem:[#allocation4 + $0x130] sm:$0xff]  ;;  %v297_v1 = vld [vmem:[#allocation4 + $0x148] sm:$0xff]  ;;  %v299_v2 = vld [vmem:[#allocation4 + $0x158] sm:$0xff]  ;;  %v802_v3 = vpack.c.bf16 %v351_v60, %v349_v59 }
  0x55   :  { %787 = vmatprep.subr.bf16.mxu0 %v786_v19  ;;  %733 = vmatpush1.bf16.msra.mxu1 %v732_v22  ;;  %v348_v4 = vld [vmem:[#allocation4 + $0x2e0] sm:$0xff]  ;;  %v350_v5 = vld [vmem:[#allocation4 + $0x2f0] sm:$0xff]  ;;  %v748_v6 = vpack.c.bf16 %v294_v63, %v292_v62  ;;  %v353_v7 = vld [vmem:[#allocation4 + $0x308] sm:$0xff]  ;;  %v750_v9 = vpack.c.bf16 %v299_v2, %v297_v1 }
  0x56   :  { %735 = vmatprep.subr.bf16.mxu1 %v734_v25  ;;  %v355_v8 = vld [vmem:[#allocation4 + $0x318] sm:$0xff]  ;;  %v296_v10 = vld [vmem:[#allocation4 + $0x140] sm:$0xff]  ;;  %v298_v11 = vld [vmem:[#allocation4 + $0x150] sm:$0xff]  ;;  %v804_v12 = vpack.c.bf16 %v350_v5, %v348_v4 }
  0x57   :  { %v301_v13 = vld [vmem:[#allocation4 + $0x168] sm:$0xff]  ;;  %v303_v14 = vld [vmem:[#allocation4 + $0x178] sm:$0xff]  ;;  %v806_v15 = vpack.c.bf16 %v355_v8, %v353_v7  ;;  %v352_v16 = vld [vmem:[#allocation4 + $0x300] sm:$0xff]  ;;  %v752_v18 = vpack.c.bf16 %v298_v11, %v296_v10 }
  0x58   :  { %789 = vmatpush1.bf16.msra.mxu0 %v788_v28  ;;  %v354_v17 = vld [vmem:[#allocation4 + $0x310] sm:$0xff]  ;;  %v357_v19 = vld [vmem:[#allocation4 + $0x328] sm:$0xff]  ;;  %v359_v20 = vld [vmem:[#allocation4 + $0x338] sm:$0xff]  ;;  %v754_v21 = vpack.c.bf16 %v303_v14, %v301_v13 }
  0x59   :  { %791 = vmatprep.subr.bf16.mxu0 %v790_v31  ;;  %737 = vmatpush1.bf16.msra.mxu1 %v736_v34  ;;  %v300_v22 = vld [vmem:[#allocation4 + $0x160] sm:$0xff]  ;;  %v302_v23 = vld [vmem:[#allocation4 + $0x170] sm:$0xff]  ;;  %v808_v24 = vpack.c.bf16 %v354_v17, %v352_v16  ;;  %v305_v25 = vld [vmem:[#allocation4 + $0x188] sm:$0xff]  ;;  %v810_v27 = vpack.c.bf16 %v359_v20, %v357_v19 }
  0x5a   :  { %739 = vmatprep.subr.bf16.mxu1 %v738_v37  ;;  %v307_v26 = vld [vmem:[#allocation4 + $0x198] sm:$0xff]  ;;  %v356_v28 = vld [vmem:[#allocation4 + $0x320] sm:$0xff]  ;;  %v358_v29 = vld [vmem:[#allocation4 + $0x330] sm:$0xff]  ;;  %v756_v30 = vpack.c.bf16 %v302_v23, %v300_v22 }
  0x5b   :  { %v361_v31 = vld [vmem:[#allocation4 + $0x348] sm:$0xff]  ;;  %v363_v32 = vld [vmem:[#allocation4 + $0x358] sm:$0xff]  ;;  %v758_v33 = vpack.c.bf16 %v307_v26, %v305_v25  ;;  %v304_v34 = vld [vmem:[#allocation4 + $0x180] sm:$0xff]  ;;  %v812_v36 = vpack.c.bf16 %v358_v29, %v356_v28  ;;  %v86_v29 = vlaneseq }
  0x5c   :  { %793 = vmatpush1.bf16.msra.mxu0 %v792_v40  ;;  %v306_v35 = vld [vmem:[#allocation4 + $0x190] sm:$0xff]  ;;  %v309_v37 = vld [vmem:[#allocation4 + $0x1a8] sm:$0xff]  ;;  %v311_v38 = vld [vmem:[#allocation4 + $0x1b8] sm:$0xff]  ;;  %v814_v39 = vpack.c.bf16 %v363_v32, %v361_v31 }
  0x5d   :  { %795 = vmatprep.subr.bf16.mxu0 %v794_v43  ;;  %741 = vmatpush1.bf16.msra.mxu1 %v740_v46  ;;  %v360_v40 = vld [vmem:[#allocation4 + $0x340] sm:$0xff]  ;;  %v362_v41 = vld [vmem:[#allocation4 + $0x350] sm:$0xff]  ;;  %v760_v42 = vpack.c.bf16 %v306_v35, %v304_v34  ;;  %v365_v43 = vld [vmem:[#allocation4 + $0x368] sm:$0xff]  ;;  %v762_v45 = vpack.c.bf16 %v311_v38, %v309_v37 }
  0x5e   :  { %743 = vmatprep.subr.bf16.mxu1 %v742_v49  ;;  %v367_v44 = vld [vmem:[#allocation4 + $0x378] sm:$0xff]  ;;  %v308_v46 = vld [vmem:[#allocation4 + $0x1a0] sm:$0xff]  ;;  %v310_v47 = vld [vmem:[#allocation4 + $0x1b0] sm:$0xff]  ;;  %v816_v48 = vpack.c.bf16 %v362_v41, %v360_v40 }
  0x5f   :  { %v313_v49 = vld [vmem:[#allocation4 + $0x1c8] sm:$0xff]  ;;  %v315_v50 = vld [vmem:[#allocation4 + $0x1d8] sm:$0xff]  ;;  %v818_v51 = vpack.c.bf16 %v367_v44, %v365_v43  ;;  %v366_v53 = vld [vmem:[#allocation4 + $0x370] sm:$0xff]  ;;  %v764_v54 = vpack.c.bf16 %v310_v47, %v308_v46 }
  0x60   :  { %797 = vmatpush1.bf16.msra.mxu0 %v796_v52  ;;  %v364_v52 = vld [vmem:[#allocation4 + $0x360] sm:$0xff]  ;;  %v371_v56 = vld [vmem:[#allocation4 + $0x398] sm:$0xff]  ;;  %v766_v57 = vpack.c.bf16 %v315_v50, %v313_v49  ;;  %v317_v2 = vld [vmem:[#allocation4 + $0x1e8] sm:$0xff] }
  0x61   :  { %799 = vmatprep.subr.bf16.mxu0 %v798_v55  ;;  %745 = vmatpush1.bf16.msra.mxu1 %v744_v58  ;;  %v369_v55 = vld [vmem:[#allocation4 + $0x388] sm:$0xff]  ;;  %v820_v58 = vpack.c.bf16 %v366_v53, %v364_v52  ;;  %v312_v60 = vld [vmem:[#allocation4 + $0x1c0] sm:$0xff]  ;;  %v318_v8 = vld [vmem:[#allocation4 + $0x1f0] sm:$0xff] }
  0x62   :  { %747 = vmatprep.subr.bf16.mxu1 %v746_v61  ;;  %v822_v59 = vpack.c.bf16 %v371_v56, %v369_v55  ;;  %v314_v61 = vld [vmem:[#allocation4 + $0x1d0] sm:$0xff]  ;;  %v368_v62 = vld [vmem:[#allocation4 + $0x380] sm:$0xff]  ;;  %v373_v4 = vld [vmem:[#allocation4 + $0x3a8] sm:$0xff] }
  0x63   :  { %v768_v63 = vpack.c.bf16 %v314_v61, %v312_v60  ;;  %v316_v7 = vld [vmem:[#allocation4 + $0x1e0] sm:$0xff]  ;;  %v377_v14 = vld [vmem:[#allocation4 + $0x3c8] sm:$0xff]  ;;  %v558_v44 = vld [vmem:[#allocation6 + $0x90] sm:$0xff] }
  0x64   :  { %801 = vmatpush1.bf16.msra.mxu0 %v800_v0  ;;  %v370_v0 = vld [vmem:[#allocation4 + $0x390] sm:$0xff]  ;;  %v772_v10 = vpack.c.bf16 %v318_v8, %v316_v7  ;;  %v372_v11 = vld [vmem:[#allocation4 + $0x3a0] sm:$0xff]  ;;  %v381_v20 = vld [vmem:[#allocation4 + $0x3e8] sm:$0xff] }
  0x65   :  { %803 = vmatprep.subr.bf16.mxu0 %v802_v3  ;;  %749 = vmatpush1.bf16.msra.mxu1 %v748_v6  ;;  %v824_v1 = vpack.c.bf16 %v370_v0, %v368_v62  ;;  %v319_v3 = vld [vmem:[#allocation4 + $0x1f8] sm:$0xff]  ;;  %v376_v17 = vld [vmem:[#allocation4 + $0x3c0] sm:$0xff]  ;;  %v541_v41 = vld [vmem:[#allocation6 + $0x8] sm:$0xff] }
  0x66   :  { %751 = vmatprep.subr.bf16.mxu1 %v750_v9  ;;  %v770_v5 = vpack.c.bf16 %v319_v3, %v317_v2  ;;  %v375_v6 = vld [vmem:[#allocation4 + $0x3b8] sm:$0xff]  ;;  %v380_v23 = vld [vmem:[#allocation4 + $0x3e0] sm:$0xff]  ;;  %v561_v55 = vld [vmem:[#allocation6 + $0xa8] sm:$0xff] }
  0x67   :  { %v826_v9 = vpack.c.bf16 %v375_v6, %v373_v4  ;;  %v556_v26 = vld [vmem:[#allocation6 + $0x80] sm:$0xff]  ;;  %v543_v52 = vld [vmem:[#allocation6 + $0x18] sm:$0xff]  ;;  %v545_v62 = vld [vmem:[#allocation6 + $0x28] sm:$0xff] }
  0x68   :  { %805 = vmatpush1.bf16.msra.mxu0 %v804_v12  ;;  %v374_v12 = vld [vmem:[#allocation4 + $0x3b0] sm:$0xff]  ;;  %v84_v32 = vld [vmem:[%s1073_s2] sm:$0xf]  ;;  %v547_v7 = vld [vmem:[#allocation6 + $0x38] sm:$0xff] }
  0x69   :  { %807 = vmatprep.subr.bf16.mxu0 %v806_v15  ;;  %753 = vmatpush1.bf16.msra.mxu1 %v752_v18  ;;  %v828_v13 = vpack.c.bf16 %v374_v12, %v372_v11  ;;  %v379_v15 = vld [vmem:[#allocation4 + $0x3d8] sm:$0xff]  ;;  %v378_v18 = vld [vmem:[#allocation4 + $0x3d0] sm:$0xff]  ;;  %v540_v40 = vld [vmem:[#allocation6] sm:$0xff] }
  0x6a   :  { %755 = vmatprep.subr.bf16.mxu1 %v754_v21  ;;  %v830_v16 = vpack.c.bf16 %v379_v15, %v377_v14  ;;  %v832_v19 = vpack.c.bf16 %v378_v18, %v376_v17  ;;  %v383_v21 = vld [vmem:[#allocation4 + $0x3f8] sm:$0xff]  ;;  %v544_v61 = vld [vmem:[#allocation6 + $0x20] sm:$0xff]  ;;  %v562_v0 = vld [vmem:[#allocation6 + $0xb0] sm:$0xff] }
  0x6b   :  { %v834_v22 = vpack.c.bf16 %v383_v21, %v381_v20  ;;  %v848_v3 = vpack.c.bf16 %v545_v62, %v544_v61  ;;  %v546_v6 = vld [vmem:[#allocation6 + $0x30] sm:$0xff]  ;;  %v564_v8 = vld [vmem:[#allocation6 + $0xc0] sm:$0xff] }
  0x6c   :  { %809 = vmatpush1.bf16.msra.mxu0 %v808_v24  ;;  %v382_v24 = vld [vmem:[#allocation4 + $0x3f0] sm:$0xff]  ;;  %v548_v12 = vld [vmem:[#allocation6 + $0x40] sm:$0xff] }
  0x6d   :  { %811 = vmatprep.subr.bf16.mxu0 %v810_v27  ;;  %757 = vmatpush1.bf16.msra.mxu1 %v756_v30  ;;  %v836_v25 = vpack.c.bf16 %v382_v24, %v380_v23  ;;  %v557_v27 = vld [vmem:[#allocation6 + $0x88] sm:$0xff]  ;;  %v1045_v30 = vshrl.u32 %v86_v29, 7  ;;  %v566_v15 = vld [vmem:[#allocation6 + $0xd0] sm:$0xff]  ;;  %v568_v21 = vld [vmem:[#allocation6 + $0xe0] sm:$0xff] }
  0x6e   :  { %759 = vmatprep.subr.bf16.mxu1 %v758_v33  ;;  %v838_v28 = vpack.c.bf16 %v557_v27, %v556_v26  ;;  %v550_v18 = vld [vmem:[#allocation6 + $0x50] sm:$0xff]  ;;  %v552_v24 = vld [vmem:[#allocation6 + $0x60] sm:$0xff] }
  0x6f   :  { %v88_v31 = vsub.s32 0, %v1045_v30  ;;  %v92_v33 = vsub.s32 1, %v1045_v30  ;;  %v100_v43 = vsub.s32 3, %v1045_v30  ;;  %v570_v27 = vld [vmem:[#allocation6 + $0xf0] sm:$0xff] }
  0x70   :  { %813 = vmatpush1.bf16.msra.mxu0 %v812_v36 }
  0x71   :  { %815 = vmatprep.subr.bf16.mxu0 %v814_v39  ;;  %761 = vmatpush1.bf16.msra.mxu1 %v760_v42  ;;  %v89_v34 = vrot.slane %v84_v32, %v88_v31  ;;  %v93_v35 = vrot.slane %v84_v32, %v92_v33  ;;  %v96_v39 = vsub.s32 2, %v1045_v30  ;;  %v101_v53 = vrot.slane %v84_v32, %v100_v43 }
  0x72   :  { %763 = vmatprep.subr.bf16.mxu1 %v762_v45  ;;  %v559_v45 = vld [vmem:[#allocation6 + $0x98] sm:$0xff] }
  0x73   :  { %v97_v49 = vrot.slane %v84_v32, %v96_v39  ;;  %v842_v50 = vpack.c.bf16 %v559_v45, %v558_v44  ;;  %v554_v32 = vld [vmem:[#allocation6 + $0x70] sm:$0xff] }
  0x74   :  { %817 = vmatpush1.bf16.msra.mxu0 %v816_v48  ;;  %v840_v48 = vpack.c.bf16 %v541_v41, %v540_v40 }
  0x75   :  { %819 = vmatprep.subr.bf16.mxu0 %v818_v51  ;;  %765 = vmatpush1.bf16.msra.mxu1 %v764_v54  ;;  %v542_v51 = vld [vmem:[#allocation6 + $0x10] sm:$0xff]  ;;  %v560_v54 = vld [vmem:[#allocation6 + $0xa0] sm:$0xff] }
  0x76   :  { %767 = vmatprep.subr.bf16.mxu1 %v766_v57  ;;  %v844_v57 = vpack.c.bf16 %v543_v52, %v542_v51  ;;  %v846_v60 = vpack.c.bf16 %v561_v55, %v560_v54 }
  0x78   :  { %821 = vmatpush1.bf16.msra.mxu0 %v820_v58 }
  0x79   :  { %823 = vmatprep.subr.bf16.mxu0 %v822_v59  ;;  %769 = vmatpush1.bf16.msra.mxu1 %v768_v63 }
  0x7a   :  { %771 = vmatprep.subr.bf16.mxu1 %v770_v5 }
  0x7c   :  { %825 = vmatpush1.bf16.msra.mxu0 %v824_v1  ;;  %v563_v1 = vld [vmem:[#allocation6 + $0xb8] sm:$0xff] }
  0x7d   :  { %827 = vmatprep.subr.bf16.mxu0 %v826_v9  ;;  %773 = vmatpush1.bf16.msra.mxu1 %v772_v10  ;;  %v850_v5 = vpack.c.bf16 %v563_v1, %v562_v0  ;;  %v565_v9 = vld [vmem:[#allocation6 + $0xc8] sm:$0xff]  ;;  %v852_v10 = vpack.c.bf16 %v547_v7, %v546_v6 }
  0x7e   :  { %839 = vmatprep.subr.bf16.mxu1 %v838_v28  ;;  %v854_v11 = vpack.c.bf16 %v565_v9, %v564_v8  ;;  %v571_v28 = vld [vmem:[#allocation6 + $0xf8] sm:$0xff] }
  0x7f   :  { %v866_v29 = vpack.c.bf16 %v571_v28, %v570_v27 }
  0x80   :  { %829 = vmatpush1.bf16.msra.mxu0 %v828_v13  ;;  %v549_v13 = vld [vmem:[#allocation6 + $0x48] sm:$0xff] }
  0x81   :  { %831 = vmatprep.subr.bf16.mxu0 %v830_v16  ;;  %v856_v14 = vpack.c.bf16 %v549_v13, %v548_v12  ;;  %v567_v16 = vld [vmem:[#allocation6 + $0xd8] sm:$0xff] }
  0x82   :  { %v858_v17 = vpack.c.bf16 %v567_v16, %v566_v15 }
  0x84   :  { %833 = vmatpush1.bf16.msra.mxu0 %v832_v19  ;;  %v551_v19 = vld [vmem:[#allocation6 + $0x58] sm:$0xff] }
  0x85   :  { %835 = vmatprep.subr.bf16.mxu0 %v834_v22  ;;  %v860_v20 = vpack.c.bf16 %v551_v19, %v550_v18  ;;  %v569_v22 = vld [vmem:[#allocation6 + $0xe8] sm:$0xff] }
  0x86   :  { %v862_v23 = vpack.c.bf16 %v569_v22, %v568_v21 }
  0x88   :  { %837 = vmatpush1.bf16.msra.mxu0 %v836_v25  ;;  %v553_v25 = vld [vmem:[#allocation6 + $0x68] sm:$0xff] }
  0x89   :  { %v864_v26 = vpack.c.bf16 %v553_v25, %v552_v24 }
 0x116   :  { %v176_v36 = vpop.f32.mrb[0].mxu0 }
 0x117   :  { %v177_v37 = vadd.f32 %v176_v36, %v89_v34  ;;  %v178_v38 = vpop.f32.mrb[1].mxu0  ;;  %v555_v34 = vld [vmem:[#allocation6 + $0x78] sm:$0xff]  ;;  %v384_v36 = vld [vmem:[%s1075_s4] sm:$0x3] }
 0x118   :  { %v179_v42 = vadd.f32 %v178_v38, %v93_v35  ;;  %v868_v35 = vpack.c.bf16 %v555_v34, %v554_v32  ;;  %v389_v39 = vrot.slane %v384_v36, %v88_v31  ;;  %v393_v40 = vrot.slane %v384_v36, %v92_v33 }
 0x119   :  { %v252_v46 = vmax.f32 %v177_v37, 0.0 }
 0x11a   :  { %v253_v47 = vmax.f32 %v179_v42, 0.0 }
 0x11c   :  { %460 = vmatprep.mubr.f32.mxu1 %v253_v47 }
 0x11d   :  { %461 = vmatmul.mubr.f32.vlgmr.msra.gmra.mrb[0].mxu1 %v252_v46 }
 0x11e   :  { %v247_v56 = vpop.f32.mrb[2].mxu0  ;;  %841 = vmatpush3.bf16.msra.mxu1 %v840_v48 }
 0x11f   :  { %v248_v58 = vadd.f32 %v247_v56, %v97_v49  ;;  %v249_v59 = vpop.f32.mrb[3].mxu0  ;;  %843 = vmatprep.subr.bf16.mxu1 %v842_v50  ;;  %v658_v50 = vld [vmem:[%s1077_s6] ss:$0 sm:$0xff] }
 0x120   :  { %v250_v63 = vadd.f32 %v249_v59, %v101_v53 }
 0x121   :  { %v254_v4 = vmax.f32 %v248_v58, 0.0 }
 0x122   :  { %v255_v2 = vmax.f32 %v250_v63, 0.0  ;;  %845 = vmatpush3.bf16.msra.mxu1 %v844_v57 }
 0x123   :  { %847 = vmatprep.subr.bf16.mxu1 %v846_v60 }
 0x124   :  { %531 = vmatprep.mubr.f32.mxu0 %v255_v2 }
 0x125   :  { %532 = vmatmul.mubr.f32.vlgmr.msra.gmra.mrb[4].mxu0 %v254_v4 }
 0x126   :  { %849 = vmatpush3.bf16.msra.mxu1 %v848_v3 }
 0x127   :  { %851 = vmatprep.subr.bf16.mxu1 %v850_v5 }
 0x12a   :  { %853 = vmatpush3.bf16.msra.mxu1 %v852_v10 }
 0x12b   :  { %855 = vmatprep.subr.bf16.mxu1 %v854_v11 }
 0x12e   :  { %857 = vmatpush3.bf16.msra.mxu1 %v856_v14 }
 0x12f   :  { %859 = vmatprep.subr.bf16.mxu1 %v858_v17 }
 0x132   :  { %861 = vmatpush3.bf16.msra.mxu1 %v860_v20 }
 0x133   :  { %863 = vmatprep.subr.bf16.mxu1 %v862_v23 }
 0x136   :  { %865 = vmatpush3.bf16.msra.mxu1 %v864_v26 }
 0x137   :  { %867 = vmatprep.subr.bf16.mxu1 %v866_v29 }
 0x13a   :  { %869 = vmatpush3.bf16.msra.mxu1 %v868_v35 }
 0x1f0   :  { %v462_v37 = vpop.f32.mrb[0].mxu1 }
 0x1f1   :  { %v464_v38 = vpop.f32.mrb[1].mxu1  ;;  %v463_v41 = vadd.f32 %v462_v37, %v389_v39 }
 0x1f2   :  { %v465_v42 = vadd.f32 %v464_v38, %v393_v40 }
 0x1f8   :  { %v533_v43 = vpop.f32.mrb[4].mxu0 }
 0x1f9   :  { %v534_v44 = vadd.f32 %v533_v43, %v463_v41  ;;  %v535_v45 = vpop.f32.mrb[5].mxu0 }
 0x1fa   :  { %v536_v46 = vadd.f32 %v535_v45, %v465_v42 }
 0x1fb   :  { %v538_v48 = vmax.f32 %v534_v44, 0.0 }
 0x1fc   :  { %v539_v47 = vmax.f32 %v536_v46, 0.0 }
 0x1fe   :  { %643 = vmatprep.mubr.f32.mxu1 %v539_v47 }
 0x1ff   :  { %644 = vmatmul.mubr.f32.vlgmr.msra.gmra.mrb[2].mxu1 %v538_v48 }
 0x2d2   :  { %v691_v49 = vpop.f32.mrb[2].mxu1 }
 0x2d3   :  { %v692_v51 = vpop.f32.mrb[3].mxu1 }
 0x2d4   :  { %v693_v31 = vadd.f32 %v692_v51, %v691_v49 }
 0x2d6   :  { %v646_v52 = vadd.f32 %v693_v31, %v658_v50 }
 0x2d8   :  { %649 = vst [vmem:[%s1078_s7] sm:$0xff] %v646_v52 }
 0x2d9   :  { %654 = vsyncpa [#allocation3], 1 }
 0x2da   :  { %655 = vsyncpa [#allocation5], 1 }

</bundles_post_ra>
